<compile_context>
chip_gen: v6e
topology: v6e:2x2x1
jax: 0.10.0
libtpu: 0.0.40
codegen_flags: <defaults>
</compile_context>

<pallas_src>
import functools

import jax
import jax.numpy as jnp
import numpy as np
from jax.experimental import pallas as pl
from jax.experimental.pallas import tpu as pltpu

_NEG = -1.0e30  # finite mask sentinel: exp underflows to 0, no inf/NaN risk


def _round_up(x, m):
    return ((x + m - 1) // m) * m


def _normalize_bf16(x):
    # torch.nn.functional.normalize(x, dim=-1), eps=1e-12; cast to bf16 so the
    # MXU runs native bf16 with f32 accumulation.
    x = x.astype(jnp.float32)
    ssq = jnp.sum(x * x, axis=-1, keepdims=True)
    inv = jax.lax.rsqrt(jnp.maximum(ssq, 1e-24))  # max(||x||,eps)=sqrt(max(ssq,eps^2))
    return (x * inv).astype(jnp.bfloat16)


def _oproxy_kernel(batch_ref, pprox_ref, prox_ref, lab_col_ref, lab_row_ref,
                   out_sc_ref, out_m_ref, out_s_ref,
                   bn_ref, accp_ref, accn_ref, m_ref, s_ref, *,
                   pos_alpha, pos_delta, neg_alpha, neg_delta,
                   dim, c_real, c_pad, c_blk, bs, blocks_per_split):
    """Grid = (split p, class-block k); each step handles c_blk proxy classes."""
    p = pl.program_id(0)
    k = pl.program_id(1)
    num_k = pl.num_programs(1)

    # Contract the last dim of both operands (folds ".T" into the MXU feed).
    dn = (((1,), (1,)), ((), ()))

    # ---------- per-split init: normalize the resident batch ONCE -------------
    @pl.when(k == 0)
    def _init():
        bn_ref[...] = _normalize_bf16(batch_ref[...])
        accp_ref[...] = jnp.zeros_like(accp_ref)
        accn_ref[...] = jnp.zeros_like(accn_ref)
        m_ref[...] = jnp.zeros_like(m_ref)   # running max (cat-zero added in wrapper)
        s_ref[...] = jnp.zeros_like(s_ref)   # running sum (no zero entry per split)

    # ---------- positive term (split 0 only, first step) ----------------------
    @pl.when(jnp.logical_and(k == 0, p == 0))
    def _pos():
        bn = bn_ref[...]
        ppn = _normalize_bf16(pprox_ref[...])        # proxies[labels], normalized
        pos_sims = jax.lax.dot_general(bn, ppn, dn,
                                       preferred_element_type=jnp.float32)  # (BS, BS)
        w_pos = -pos_alpha * (pos_sims - pos_delta)
        same = lab_col_ref[...] == lab_row_ref[...]  # labels[i] == labels[j]
        wm = jnp.where(same, w_pos, _NEG)
        # masked logsumexp with the implicit extra 0 entry (torch cat-zeros)
        m = jnp.maximum(jnp.max(wm, axis=dim, keepdims=True), 0.0)
        s = jnp.sum(jnp.exp(wm - m), axis=dim, keepdims=True) + jnp.exp(-m)
        lse = m + jnp.log(s)
        accp_ref[...] = jnp.sum(lse, axis=1 - dim, keepdims=True) * (1.0 / bs)

    # ---------- negative term: this block of classes --------------------------
    bn = bn_ref[...]                                 # hoisted normalized batch
    pn = _normalize_bf16(prox_ref[...])              # (Cblk, D)
    sims = jax.lax.dot_general(bn, pn, dn,
                               preferred_element_type=jnp.float32)           # (BS, Cblk)
    w_neg = neg_alpha * (sims - neg_delta)
    col = (jax.lax.broadcasted_iota(jnp.int32, (bs, c_blk), 1)
           + (p * blocks_per_split + k) * c_blk)
    mask = col != lab_col_ref[...]                   # labels[i] != class c
    if c_pad != c_real:                              # compare only if padding exists
        mask = jnp.logical_and(mask, col < c_real)
    wm = jnp.where(mask, w_neg, _NEG)

    if dim == 0:
        # ProxyAnchor: LSE over the batch axis is complete inside a block;
        # accumulate per-column LSEs (fully-masked / padded columns give 0).
        m = jnp.maximum(jnp.max(wm, axis=0, keepdims=True), 0.0)
        s = jnp.sum(jnp.exp(wm - m), axis=0, keepdims=True) + jnp.exp(-m)
        accn_ref[...] += jnp.sum(m + jnp.log(s), axis=1, keepdims=True)
    else:
        # ProxyNCA: online (streaming) logsumexp over the class axis.
        # m starts at 0 so fully-masked rows keep exp(-1e30 - m) == 0 (no NaN).
        bm = jnp.max(wm, axis=1, keepdims=True)
        m_new = jnp.maximum(m_ref[...], bm)
        s_ref[...] = (s_ref[...] * jnp.exp(m_ref[...] - m_new)
                      + jnp.sum(jnp.exp(wm - m_new), axis=1, keepdims=True))
        m_ref[...] = m_new

    # ---------- finalize this split --------------------------------------------
    @pl.when(k == num_k - 1)
    def _fin():
        if dim == 0:
            out_sc_ref[0] = accp_ref[...] + accn_ref[...] * (1.0 / c_real)
            out_m_ref[0] = jnp.zeros((bs, 1), jnp.float32)
            out_s_ref[0] = jnp.zeros((bs, 1), jnp.float32)
        else:
            out_sc_ref[0] = accp_ref[...]
            out_m_ref[0] = m_ref[...]
            out_s_ref[0] = s_ref[...]


def oproxy_loss(batch, proxies, labels, *,
                pos_alpha=32.0, pos_delta=0.1,
                neg_alpha=32.0, neg_delta=-0.1,
                mode="anchor", c_block=None, n_split=None,
                vmem_limit_bytes=None):
    """ProxyAnchor (mode='anchor') / ProxyNCA (mode='nca') loss."""
    bs, d = batch.shape
    c, d2 = proxies.shape
    assert d == d2
    dim = 1 if mode == "nca" else 0
    labels = labels.astype(jnp.int32)
    itemsize = jnp.dtype(proxies.dtype).itemsize

    # ---- VMEM budget: generation-aware when the TPU info is queryable --------
    if vmem_limit_bytes is None:
        try:
            cap = int(pltpu.get_tpu_info().vmem_capacity_bytes)
            vmem_limit_bytes = min(cap * 3 // 4, 100 * 1024 * 1024)
        except Exception:   # unknown generation: conservative (fits v7x's 64 MiB)
            vmem_limit_bytes = 32 * 1024 * 1024
    vmem_limit_bytes = int(vmem_limit_bytes)

    # ---- class-dimension tiling: lane-dense blocks sized to the budget -------
    resident = 2 * (2 * bs * d * itemsize) + bs * d * 2  # dbl-buffered batch/pos_prox + bn scratch
    if c_block is None:
        budget = max(vmem_limit_bytes - resident, 2 * 1024 * 1024) // 4
        c_block = min(max(512, budget // max(1, d * itemsize)), 8192)
    c_blk = _round_up(min(int(c_block), max(c, 1)), 128)   # lane-dense proxy block
    num_blocks = -(-c // c_blk)

    # ---- optional 2-way parallel split over the class reduction (v7x) --------
    if n_split is None:
        # only auto-enable when it adds no padded blocks (harmless on 1-TC chips)
        n_split = 2 if (num_blocks >= 4 and num_blocks % 2 == 0) else 1
    n_split = max(1, min(int(n_split), num_blocks))
    blocks_per_split = -(-num_blocks // n_split)
    c_pad = n_split * blocks_per_split * c_blk
    proxies_p = proxies if c_pad == c else jnp.pad(proxies, ((0, c_pad - c), (0, 0)))

    # positives gathered by label in the wrapper (replaces sims @ onehot.T)
    pos_prox = jnp.take(proxies, labels, axis=0)            # (BS, D)
    lab_col = labels.reshape(bs, 1)
    lab_row = labels.reshape(1, bs)

    kernel = functools.partial(
        _oproxy_kernel,
        pos_alpha=float(pos_alpha), pos_delta=float(pos_delta),
        neg_alpha=float(neg_alpha), neg_delta=float(neg_delta),
        dim=dim, c_real=c, c_pad=c_pad, c_blk=c_blk, bs=bs,
        blocks_per_split=blocks_per_split)

    out_sc, out_m, out_s = pl.pallas_call(
        kernel,
        out_shape=(jax.ShapeDtypeStruct((n_split, 1, 1), jnp.float32),
                   jax.ShapeDtypeStruct((n_split, bs, 1), jnp.float32),
                   jax.ShapeDtypeStruct((n_split, bs, 1), jnp.float32)),
        grid=(n_split, blocks_per_split),
        in_specs=[
            pl.BlockSpec((bs, d), lambda p, k: (0, 0)),       # batch (resident)
            pl.BlockSpec((bs, d), lambda p, k: (0, 0)),       # proxies[labels] (resident)
            pl.BlockSpec((c_blk, d),                          # proxy block (streamed over C)
                         lambda p, k: (p * blocks_per_split + k, 0)),
            pl.BlockSpec((bs, 1), lambda p, k: (0, 0)),       # labels as a column
            pl.BlockSpec((1, bs), lambda p, k: (0, 0)),       # labels as a row
        ],
        out_specs=(
            pl.BlockSpec((1, 1, 1), lambda p, k: (p, 0, 0)),   # per-split scalar partial
            pl.BlockSpec((1, bs, 1), lambda p, k: (p, 0, 0)),  # per-split nca running max
            pl.BlockSpec((1, bs, 1), lambda p, k: (p, 0, 0)),  # per-split nca running sum
        ),
        scratch_shapes=[
            pltpu.VMEM((bs, d), jnp.bfloat16),   # hoisted normalized batch
            pltpu.VMEM((1, 1), jnp.float32),     # positive-term mean
            pltpu.VMEM((1, 1), jnp.float32),     # negative col-LSE accumulator (anchor)
            pltpu.VMEM((bs, 1), jnp.float32),    # online-LSE running max (nca)
            pltpu.VMEM((bs, 1), jnp.float32),    # online-LSE running sum (nca)
        ],
        compiler_params=pltpu.CompilerParams(
            dimension_semantics=("parallel", "arbitrary"),     # split ||, C reduction
            vmem_limit_bytes=vmem_limit_bytes),
    )(batch, pos_prox, proxies_p, lab_col, lab_row)

    if dim == 0:
        # ProxyAnchor: per-split partials (pos only in split 0) simply add up.
        return jnp.sum(out_sc)
    # ProxyNCA: combine per-split streaming (m, s), adding the single implicit
    # zero entry (torch cat-zeros) exactly once, then mean over the batch rows.
    m = out_m[:, :, 0]                                        # (n_split, BS)
    s = out_s[:, :, 0]
    big = jnp.maximum(jnp.max(m, axis=0), 0.0)                # (BS,)
    s_tot = jnp.sum(s * jnp.exp(m - big[None, :]), axis=0) + jnp.exp(-big)
    lse = big + jnp.log(s_tot)
    return jnp.sum(out_sc) + jnp.mean(lse)


def _reference_loss(batch, proxies, labels, *, pos_alpha, pos_delta,
                    neg_alpha, neg_delta, mode):
    """Pure-JAX mirror of Criterion.forward (same bf16 MXU precision as the kernel)."""
    dim = 1 if mode == "nca" else 0

    def norm(x):
        x = x.astype(jnp.float32)
        ssq = jnp.sum(x * x, axis=-1, keepdims=True)
        return x * jax.lax.rsqrt(jnp.maximum(ssq, 1e-24))

    bn = norm(batch).astype(jnp.bfloat16)
    pn = norm(proxies).astype(jnp.bfloat16)
    sims = jnp.dot(bn, pn.T, preferred_element_type=jnp.float32)
    pos_sims = jnp.dot(bn, pn[labels].T, preferred_element_type=jnp.float32)
    same = labels[:, None] == labels[None, :]
    diff = labels[:, None] != jnp.arange(proxies.shape[0])[None, :]
    w_pos = -pos_alpha * (pos_sims - pos_delta)
    w_neg = neg_alpha * (sims - neg_delta)
    neg_min = jnp.finfo(jnp.float32).min

    def mlse_mean(w, mask, axis):
        wm = jnp.where(mask, w, neg_min)
        zshape = list(wm.shape)
        zshape[axis] = 1
        cat = jnp.concatenate([wm, jnp.zeros(zshape, wm.dtype)], axis=axis)
        lse = jax.scipy.special.logsumexp(cat, axis=axis, keepdims=True)
        lse = jnp.where(jnp.any(mask, axis=axis, keepdims=True), lse, 0.0)
        return jnp.mean(lse)

    return mlse_mean(w_pos, same, dim) + mlse_mean(w_neg, diff, dim)


if __name__ == "__main__":
    key = jax.random.PRNGKey(0)
    params = dict(pos_alpha=32.0, pos_delta=0.1, neg_alpha=32.0, neg_delta=-0.1)

    # (bs, embed_dim, n_classes, c_block, n_split, mode)
    cases = [
        (16, 64, 24, None, None, "anchor"),   # single (padded-to-128) block, ProxyAnchor
        (16, 64, 24, None, None, "nca"),      # single block, ProxyNCA
        (16, 64, 200, 128, 1, "anchor"),      # 2 streamed class blocks, one split
        (16, 64, 200, 128, 1, "nca"),         # streaming / online-LSE path
        (16, 64, 300, 128, 2, "anchor"),      # 2-way parallel split + padded classes
        (16, 64, 300, 128, 2, "nca"),         # cross-split online-LSE combine
    ]
    for i, (bs, d, c, c_block, n_split, mode) in enumerate(cases):
        kb, kp, kl = jax.random.split(jax.random.fold_in(key, i), 3)
        batch = jax.random.normal(kb, (bs, d), dtype=jnp.float32)
        proxies = jax.random.normal(kp, (c, d), dtype=jnp.float32) / 8.0
        labels = jax.random.randint(kl, (bs,), 0, c, dtype=jnp.int32)

        loss = oproxy_loss(batch, proxies, labels, mode=mode,
                           c_block=c_block, n_split=n_split, **params)
        loss = jax.block_until_ready(loss)

        ref = _reference_loss(batch, proxies, labels, mode=mode, **params)
        np.testing.assert_allclose(np.asarray(loss), np.asarray(ref),
                                   rtol=1e-2, atol=1e-2)

    print("KERNEL_OK")
</pallas_src>

<mosaic_0001>
module attributes {stable_mosaic.version = 11 : i64} {
  func.func @_oproxy_kernel(%arg0: i32, %arg1: i32, %arg2: memref<16x64xf32, #tpu.memory_space<vmem>>, %arg3: memref<16x64xf32, #tpu.memory_space<vmem>>, %arg4: memref<128x64xf32, #tpu.memory_space<vmem>>, %arg5: memref<16x1xi32, #tpu.memory_space<vmem>>, %arg6: memref<1x16xi32, #tpu.memory_space<vmem>>, %arg7: memref<1x1x1xf32, #tpu.memory_space<vmem>>, %arg8: memref<1x16x1xf32, #tpu.memory_space<vmem>>, %arg9: memref<1x16x1xf32, #tpu.memory_space<vmem>>, %arg10: memref<16x64xbf16, #tpu.memory_space<vmem>>, %arg11: memref<1x1xf32, #tpu.memory_space<vmem>>, %arg12: memref<1x1xf32, #tpu.memory_space<vmem>>, %arg13: memref<16x1xf32, #tpu.memory_space<vmem>>, %arg14: memref<16x1xf32, #tpu.memory_space<vmem>>) attributes {dimension_semantics = [#tpu.dimension_semantics<parallel>, #tpu.dimension_semantics<arbitrary>], iteration_bounds = array<i64: 1, 1>, scalar_prefetch = 0 : i64, scratch_operands = 5 : i64, tpu.core_type = #tpu.core_type<tc>, window_params = [{pipeline_mode = #tpu.pipeline_mode<synchronous>, transform_indices = @transform_0, window_bounds = array<i64: 16, 64>}, {pipeline_mode = #tpu.pipeline_mode<synchronous>, transform_indices = @transform_1, window_bounds = array<i64: 16, 64>}, {transform_indices = @transform_2, window_bounds = array<i64: 128, 64>}, {pipeline_mode = #tpu.pipeline_mode<synchronous>, transform_indices = @transform_3, window_bounds = array<i64: 16, 1>}, {pipeline_mode = #tpu.pipeline_mode<synchronous>, transform_indices = @transform_4, window_bounds = array<i64: 1, 16>}, {transform_indices = @transform_5, window_bounds = array<i64: 1, 1, 1>}, {transform_indices = @transform_6, window_bounds = array<i64: 1, 16, 1>}, {transform_indices = @transform_7, window_bounds = array<i64: 1, 16, 1>}]} {
    %c0_i32 = arith.constant 0 : i32
    %0 = arith.cmpi eq, %arg1, %c0_i32 : i32
    %1 = arith.extui %0 : i1 to i32
    %c0_i32_0 = arith.constant 0 : i32
    %2 = arith.cmpi ne, %1, %c0_i32_0 : i32
    scf.if %2 {
      %c0_25 = arith.constant 0 : index
      %c0_26 = arith.constant 0 : index
      %61 = vector.load %arg2[%c0_25, %c0_26] : memref<16x64xf32, #tpu.memory_space<vmem>>, vector<16x64xf32>
      %62 = arith.mulf %61, %61 : vector<16x64xf32>
      %cst_27 = arith.constant dense<0.000000e+00> : vector<16xf32>
      %63 = vector.multi_reduction <add>, %62, %cst_27 [1] : vector<16x64xf32> to vector<16xf32>
      %64 = vector.shape_cast %63 : vector<16xf32> to vector<16x1xf32>
      %cst_28 = arith.constant 1.000000e-24 : f32
      %65 = vector.broadcast %cst_28 : f32 to vector<16x1xf32>
      %66 = arith.maximumf %64, %65 : vector<16x1xf32>
      %67 = math.rsqrt %66 : vector<16x1xf32>
      %68 = vector.broadcast %67 : vector<16x1xf32> to vector<16x64xf32>
      %69 = arith.mulf %61, %68 : vector<16x64xf32>
      %70 = arith.truncf %69 : vector<16x64xf32> to vector<16x64xbf16>
      %c0_29 = arith.constant 0 : index
      %c0_30 = arith.constant 0 : index
      %71 = vector.load %arg10[%c0_29, %c0_30] : memref<16x64xbf16, #tpu.memory_space<vmem>>, vector<16x64xbf16>
      tpu.vector_store %arg10[%c0_29, %c0_30], %70 {strides = array<i32>} : memref<16x64xbf16, #tpu.memory_space<vmem>>, vector<16x64xbf16>,
      %cst_31 = arith.constant 0.000000e+00 : f32
      %72 = vector.broadcast %cst_31 : f32 to vector<1x1xf32>
      %c0_32 = arith.constant 0 : index
      %c0_33 = arith.constant 0 : index
      %73 = vector.load %arg11[%c0_32, %c0_33] : memref<1x1xf32, #tpu.memory_space<vmem>>, vector<1x1xf32>
      tpu.vector_store %arg11[%c0_32, %c0_33], %72 {strides = array<i32>} : memref<1x1xf32, #tpu.memory_space<vmem>>, vector<1x1xf32>,
      %cst_34 = arith.constant 0.000000e+00 : f32
      %74 = vector.broadcast %cst_34 : f32 to vector<1x1xf32>
      %c0_35 = arith.constant 0 : index
      %c0_36 = arith.constant 0 : index
      %75 = vector.load %arg12[%c0_35, %c0_36] : memref<1x1xf32, #tpu.memory_space<vmem>>, vector<1x1xf32>
      tpu.vector_store %arg12[%c0_35, %c0_36], %74 {strides = array<i32>} : memref<1x1xf32, #tpu.memory_space<vmem>>, vector<1x1xf32>,
      %cst_37 = arith.constant 0.000000e+00 : f32
      %76 = vector.broadcast %cst_37 : f32 to vector<16x1xf32>
      %c0_38 = arith.constant 0 : index
      %c0_39 = arith.constant 0 : index
      %77 = vector.load %arg13[%c0_38, %c0_39] : memref<16x1xf32, #tpu.memory_space<vmem>>, vector<16x1xf32>
      tpu.vector_store %arg13[%c0_38, %c0_39], %76 {strides = array<i32>} : memref<16x1xf32, #tpu.memory_space<vmem>>, vector<16x1xf32>,
      %cst_40 = arith.constant 0.000000e+00 : f32
      %78 = vector.broadcast %cst_40 : f32 to vector<16x1xf32>
      %c0_41 = arith.constant 0 : index
      %c0_42 = arith.constant 0 : index
      %79 = vector.load %arg14[%c0_41, %c0_42] : memref<16x1xf32, #tpu.memory_space<vmem>>, vector<16x1xf32>
      tpu.vector_store %arg14[%c0_41, %c0_42], %78 {strides = array<i32>} : memref<16x1xf32, #tpu.memory_space<vmem>>, vector<16x1xf32>,
    } else {
    }
    %c0_i32_1 = arith.constant 0 : i32
    %3 = arith.cmpi eq, %arg1, %c0_i32_1 : i32
    %c0_i32_2 = arith.constant 0 : i32
    %4 = arith.cmpi eq, %arg0, %c0_i32_2 : i32
    %5 = arith.andi %3, %4 : i1
    %6 = arith.extui %5 : i1 to i32
    %c0_i32_3 = arith.constant 0 : i32
    %7 = arith.cmpi ne, %6, %c0_i32_3 : i32
    scf.if %7 {
      %c0_25 = arith.constant 0 : index
      %c0_26 = arith.constant 0 : index
      %61 = vector.load %arg10[%c0_25, %c0_26] : memref<16x64xbf16, #tpu.memory_space<vmem>>, vector<16x64xbf16>
      %c0_27 = arith.constant 0 : index
      %c0_28 = arith.constant 0 : index
      %62 = vector.load %arg3[%c0_27, %c0_28] : memref<16x64xf32, #tpu.memory_space<vmem>>, vector<16x64xf32>
      %63 = arith.mulf %62, %62 : vector<16x64xf32>
      %cst_29 = arith.constant dense<0.000000e+00> : vector<16xf32>
      %64 = vector.multi_reduction <add>, %63, %cst_29 [1] : vector<16x64xf32> to vector<16xf32>
      %65 = vector.shape_cast %64 : vector<16xf32> to vector<16x1xf32>
      %cst_30 = arith.constant 1.000000e-24 : f32
      %66 = vector.broadcast %cst_30 : f32 to vector<16x1xf32>
      %67 = arith.maximumf %65, %66 : vector<16x1xf32>
      %68 = math.rsqrt %67 : vector<16x1xf32>
      %69 = vector.broadcast %68 : vector<16x1xf32> to vector<16x64xf32>
      %70 = arith.mulf %62, %69 : vector<16x64xf32>
      %71 = arith.truncf %70 : vector<16x64xf32> to vector<16x64xbf16>
      %cst_31 = arith.constant dense<0.000000e+00> : vector<16x16xf32>
      %72 = tpu.matmul %61, %71, %cst_31 {dimension_numbers = #tpu.dot_dimension_numbers<[1], [1], [0], [0], [0, 0, 1, 0], [], []>} : vector<16x64xbf16>, vector<16x64xbf16>, vector<16x16xf32> -> vector<16x16xf32>
      %cst_32 = arith.constant 1.000000e-01 : f32
      %73 = vector.broadcast %cst_32 : f32 to vector<16x16xf32>
      %74 = arith.subf %72, %73 : vector<16x16xf32>
      %cst_33 = arith.constant -3.200000e+01 : f32
      %75 = vector.broadcast %cst_33 : f32 to vector<16x16xf32>
      %76 = arith.mulf %75, %74 : vector<16x16xf32>
      %c0_34 = arith.constant 0 : index
      %c0_35 = arith.constant 0 : index
      %77 = vector.load %arg5[%c0_34, %c0_35] : memref<16x1xi32, #tpu.memory_space<vmem>>, vector<16x1xi32>
      %c0_36 = arith.constant 0 : index
      %c0_37 = arith.constant 0 : index
      %78 = vector.load %arg6[%c0_36, %c0_37] : memref<1x16xi32, #tpu.memory_space<vmem>>, vector<1x16xi32>
      %79 = vector.broadcast %77 : vector<16x1xi32> to vector<16x16xi32>
      %80 = vector.broadcast %78 : vector<1x16xi32> to vector<16x16xi32>
      %81 = arith.cmpi eq, %79, %80 : vector<16x16xi32>
      %cst_38 = arith.constant -1.000000e+30 : f32
      %82 = vector.broadcast %cst_38 : f32 to vector<16x16xf32>
      %83 = arith.select %81, %76, %82 : vector<16x16xi1>, vector<16x16xf32>
      %cst_39 = arith.constant dense<0xFF800000> : vector<16xf32>
      %84 = vector.multi_reduction <maximumf>, %83, %cst_39 [0] : vector<16x16xf32> to vector<16xf32>
      %85 = vector.shape_cast %84 : vector<16xf32> to vector<1x16xf32>
      %cst_40 = arith.constant 0.000000e+00 : f32
      %86 = vector.broadcast %cst_40 : f32 to vector<1x16xf32>
      %87 = arith.maximumf %85, %86 : vector<1x16xf32>
      %88 = vector.broadcast %87 : vector<1x16xf32> to vector<16x16xf32>
      %89 = arith.subf %83, %88 : vector<16x16xf32>
      %90 = math.exp %89 : vector<16x16xf32>
      %cst_41 = arith.constant dense<0.000000e+00> : vector<16xf32>
      %91 = vector.multi_reduction <add>, %90, %cst_41 [0] : vector<16x16xf32> to vector<16xf32>
      %92 = vector.shape_cast %91 : vector<16xf32> to vector<1x16xf32>
      %cst_42 = arith.constant 0.000000e+00 : f32
      %93 = vector.broadcast %cst_42 : f32 to vector<1x16xf32>
      %94 = arith.subf %93, %87 : vector<1x16xf32>
      %95 = math.exp %94 : vector<1x16xf32>
      %96 = arith.addf %92, %95 : vector<1x16xf32>
      %97 = math.log %96 : vector<1x16xf32>
      %98 = arith.addf %87, %97 : vector<1x16xf32>
      %cst_43 = arith.constant dense<0.000000e+00> : vector<1xf32>
      %99 = vector.multi_reduction <add>, %98, %cst_43 [1] : vector<1x16xf32> to vector<1xf32>
      %100 = vector.shape_cast %99 : vector<1xf32> to vector<1x1xf32>
      %cst_44 = arith.constant 6.250000e-02 : f32
      %101 = vector.broadcast %cst_44 : f32 to vector<1x1xf32>
      %102 = arith.mulf %100, %101 : vector<1x1xf32>
      %c0_45 = arith.constant 0 : index
      %c0_46 = arith.constant 0 : index
      %103 = vector.load %arg11[%c0_45, %c0_46] : memref<1x1xf32, #tpu.memory_space<vmem>>, vector<1x1xf32>
      tpu.vector_store %arg11[%c0_45, %c0_46], %102 {strides = array<i32>} : memref<1x1xf32, #tpu.memory_space<vmem>>, vector<1x1xf32>,
    } else {
    }
    %c0 = arith.constant 0 : index
    %c0_4 = arith.constant 0 : index
    %8 = vector.load %arg10[%c0, %c0_4] : memref<16x64xbf16, #tpu.memory_space<vmem>>, vector<16x64xbf16>
    %c0_5 = arith.constant 0 : index
    %c0_6 = arith.constant 0 : index
    %9 = vector.load %arg4[%c0_5, %c0_6] : memref<128x64xf32, #tpu.memory_space<vmem>>, vector<128x64xf32>
    %10 = arith.mulf %9, %9 : vector<128x64xf32>
    %cst = arith.constant dense<0.000000e+00> : vector<128xf32>
    %11 = vector.multi_reduction <add>, %10, %cst [1] : vector<128x64xf32> to vector<128xf32>
    %12 = vector.shape_cast %11 : vector<128xf32> to vector<128x1xf32>
    %cst_7 = arith.constant 1.000000e-24 : f32
    %13 = vector.broadcast %cst_7 : f32 to vector<128x1xf32>
    %14 = arith.maximumf %12, %13 : vector<128x1xf32>
    %15 = math.rsqrt %14 : vector<128x1xf32>
    %16 = vector.broadcast %15 : vector<128x1xf32> to vector<128x64xf32>
    %17 = arith.mulf %9, %16 : vector<128x64xf32>
    %18 = arith.truncf %17 : vector<128x64xf32> to vector<128x64xbf16>
    %cst_8 = arith.constant dense<0.000000e+00> : vector<16x128xf32>
    %19 = tpu.matmul %8, %18, %cst_8 {dimension_numbers = #tpu.dot_dimension_numbers<[1], [1], [0], [0], [0, 0, 1, 0], [], []>} : vector<16x64xbf16>, vector<128x64xbf16>, vector<16x128xf32> -> vector<16x128xf32>
    %cst_9 = arith.constant -1.000000e-01 : f32
    %20 = vector.broadcast %cst_9 : f32 to vector<16x128xf32>
    %21 = arith.subf %19, %20 : vector<16x128xf32>
    %cst_10 = arith.constant 3.200000e+01 : f32
    %22 = vector.broadcast %cst_10 : f32 to vector<16x128xf32>
    %23 = arith.mulf %22, %21 : vector<16x128xf32>
    %24 = tpu.iota {dimensions = array<i32: 1>} : vector<16x128xi32>
    %c1_i32 = arith.constant 1 : i32
    %25 = arith.muli %arg0, %c1_i32 : i32
    %26 = arith.addi %25, %arg1 : i32
    %c128_i32 = arith.constant 128 : i32
    %27 = arith.muli %26, %c128_i32 : i32
    %28 = vector.broadcast %27 : i32 to vector<16x128xi32>
    %29 = arith.addi %24, %28 : vector<16x128xi32>
    %c0_11 = arith.constant 0 : index
    %c0_12 = arith.constant 0 : index
    %30 = vector.load %arg5[%c0_11, %c0_12] : memref<16x1xi32, #tpu.memory_space<vmem>>, vector<16x1xi32>
    %31 = vector.broadcast %30 : vector<16x1xi32> to vector<16x128xi32>
    %32 = arith.cmpi ne, %29, %31 : vector<16x128xi32>
    %c24_i32 = arith.constant 24 : i32
    %33 = vector.broadcast %c24_i32 : i32 to vector<16x128xi32>
    %34 = arith.cmpi slt, %29, %33 : vector<16x128xi32>
    %35 = arith.andi %32, %34 : vector<16x128xi1>
    %cst_13 = arith.constant -1.000000e+30 : f32
    %36 = vector.broadcast %cst_13 : f32 to vector<16x128xf32>
    %37 = arith.select %35, %23, %36 : vector<16x128xi1>, vector<16x128xf32>
    %cst_14 = arith.constant dense<0xFF800000> : vector<128xf32>
    %38 = vector.multi_reduction <maximumf>, %37, %cst_14 [0] : vector<16x128xf32> to vector<128xf32>
    %39 = vector.shape_cast %38 : vector<128xf32> to vector<1x128xf32>
    %cst_15 = arith.constant 0.000000e+00 : f32
    %40 = vector.broadcast %cst_15 : f32 to vector<1x128xf32>
    %41 = arith.maximumf %39, %40 : vector<1x128xf32>
    %42 = vector.broadcast %41 : vector<1x128xf32> to vector<16x128xf32>
    %43 = arith.subf %37, %42 : vector<16x128xf32>
    %44 = math.exp %43 : vector<16x128xf32>
    %cst_16 = arith.constant dense<0.000000e+00> : vector<128xf32>
    %45 = vector.multi_reduction <add>, %44, %cst_16 [0] : vector<16x128xf32> to vector<128xf32>
    %46 = vector.shape_cast %45 : vector<128xf32> to vector<1x128xf32>
    %cst_17 = arith.constant 0.000000e+00 : f32
    %47 = vector.broadcast %cst_17 : f32 to vector<1x128xf32>
    %48 = arith.subf %47, %41 : vector<1x128xf32>
    %49 = math.exp %48 : vector<1x128xf32>
    %50 = arith.addf %46, %49 : vector<1x128xf32>
    %c0_18 = arith.constant 0 : index
    %c0_19 = arith.constant 0 : index
    %51 = vector.load %arg12[%c0_18, %c0_19] : memref<1x1xf32, #tpu.memory_space<vmem>>, vector<1x1xf32>
    %52 = math.log %50 : vector<1x128xf32>
    %53 = arith.addf %41, %52 : vector<1x128xf32>
    %cst_20 = arith.constant dense<0.000000e+00> : vector<1xf32>
    %54 = vector.multi_reduction <add>, %53, %cst_20 [1] : vector<1x128xf32> to vector<1xf32>
    %55 = vector.shape_cast %54 : vector<1xf32> to vector<1x1xf32>
    %56 = arith.addf %51, %55 : vector<1x1xf32>
    %c0_21 = arith.constant 0 : index
    %c0_22 = arith.constant 0 : index
    %57 = vector.load %arg12[%c0_21, %c0_22] : memref<1x1xf32, #tpu.memory_space<vmem>>, vector<1x1xf32>
    tpu.vector_store %arg12[%c0_21, %c0_22], %56 {strides = array<i32>} : memref<1x1xf32, #tpu.memory_space<vmem>>, vector<1x1xf32>,
    %c0_i32_23 = arith.constant 0 : i32
    %58 = arith.cmpi eq, %arg1, %c0_i32_23 : i32
    %59 = arith.extui %58 : i1 to i32
    %c0_i32_24 = arith.constant 0 : i32
    %60 = arith.cmpi ne, %59, %c0_i32_24 : i32
    scf.if %60 {
      %c0_25 = arith.constant 0 : index
      %c0_26 = arith.constant 0 : index
      %61 = vector.load %arg11[%c0_25, %c0_26] : memref<1x1xf32, #tpu.memory_space<vmem>>, vector<1x1xf32>
      %c0_27 = arith.constant 0 : index
      %c0_28 = arith.constant 0 : index
      %62 = vector.load %arg12[%c0_27, %c0_28] : memref<1x1xf32, #tpu.memory_space<vmem>>, vector<1x1xf32>
      %cst_29 = arith.constant 0.0416666679 : f32
      %63 = vector.broadcast %cst_29 : f32 to vector<1x1xf32>
      %64 = arith.mulf %62, %63 : vector<1x1xf32>
      %65 = arith.addf %61, %64 : vector<1x1xf32>
      %c0_30 = arith.constant 0 : index
      %c0_31 = arith.constant 0 : index
      %c0_32 = arith.constant 0 : index
      %66 = vector.load %arg7[%c0_30, %c0_31, %c0_32] : memref<1x1x1xf32, #tpu.memory_space<vmem>>, vector<1x1x1xf32>
      %67 = vector.shape_cast %66 : vector<1x1x1xf32> to vector<1x1xf32>
      %68 = vector.shape_cast %65 : vector<1x1xf32> to vector<1x1x1xf32>
      tpu.vector_store %arg7[%c0_30, %c0_31, %c0_32], %68 {strides = array<i32>} : memref<1x1x1xf32, #tpu.memory_space<vmem>>, vector<1x1x1xf32>,
      %cst_33 = arith.constant 0.000000e+00 : f32
      %69 = vector.broadcast %cst_33 : f32 to vector<16x1xf32>
      %c0_34 = arith.constant 0 : index
      %c0_35 = arith.constant 0 : index
      %c0_36 = arith.constant 0 : index
      %70 = vector.load %arg8[%c0_34, %c0_35, %c0_36] : memref<1x16x1xf32, #tpu.memory_space<vmem>>, vector<1x16x1xf32>
      %71 = vector.shape_cast %70 : vector<1x16x1xf32> to vector<16x1xf32>
      %72 = vector.shape_cast %69 : vector<16x1xf32> to vector<1x16x1xf32>
      tpu.vector_store %arg8[%c0_34, %c0_35, %c0_36], %72 {strides = array<i32>} : memref<1x16x1xf32, #tpu.memory_space<vmem>>, vector<1x16x1xf32>,
      %cst_37 = arith.constant 0.000000e+00 : f32
      %73 = vector.broadcast %cst_37 : f32 to vector<16x1xf32>
      %c0_38 = arith.constant 0 : index
      %c0_39 = arith.constant 0 : index
      %c0_40 = arith.constant 0 : index
      %74 = vector.load %arg9[%c0_38, %c0_39, %c0_40] : memref<1x16x1xf32, #tpu.memory_space<vmem>>, vector<1x16x1xf32>
      %75 = vector.shape_cast %74 : vector<1x16x1xf32> to vector<16x1xf32>
      %76 = vector.shape_cast %73 : vector<16x1xf32> to vector<1x16x1xf32>
      tpu.vector_store %arg9[%c0_38, %c0_39, %c0_40], %76 {strides = array<i32>} : memref<1x16x1xf32, #tpu.memory_space<vmem>>, vector<1x16x1xf32>,
    } else {
    }
    return
  }
  func.func @transform_0(%arg0: i32, %arg1: i32) -> (i32, i32) {
    %c0_i32 = arith.constant 0 : i32
    %c0_i32_0 = arith.constant 0 : i32
    %c0_i32_1 = arith.constant 0 : i32
    return %c0_i32, %c0_i32_0 : i32, i32
  }
  func.func @transform_1(%arg0: i32, %arg1: i32) -> (i32, i32) {
    %c0_i32 = arith.constant 0 : i32
    %c0_i32_0 = arith.constant 0 : i32
    %c0_i32_1 = arith.constant 0 : i32
    return %c0_i32, %c0_i32_0 : i32, i32
  }
  func.func @transform_2(%arg0: i32, %arg1: i32) -> (i32, i32) {
    %c1_i32 = arith.constant 1 : i32
    %0 = arith.muli %arg0, %c1_i32 : i32
    %1 = arith.addi %0, %arg1 : i32
    %c0_i32 = arith.constant 0 : i32
    %c0_i32_0 = arith.constant 0 : i32
    return %1, %c0_i32 : i32, i32
  }
  func.func @transform_3(%arg0: i32, %arg1: i32) -> (i32, i32) {
    %c0_i32 = arith.constant 0 : i32
    %c0_i32_0 = arith.constant 0 : i32
    %c0_i32_1 = arith.constant 0 : i32
    return %c0_i32, %c0_i32_0 : i32, i32
  }
  func.func @transform_4(%arg0: i32, %arg1: i32) -> (i32, i32) {
    %c0_i32 = arith.constant 0 : i32
    %c0_i32_0 = arith.constant 0 : i32
    %c0_i32_1 = arith.constant 0 : i32
    return %c0_i32, %c0_i32_0 : i32, i32
  }
  func.func @transform_5(%arg0: i32, %arg1: i32) -> (i32, i32, i32) {
    %c0_i32 = arith.constant 0 : i32
    %c0_i32_0 = arith.constant 0 : i32
    %c0_i32_1 = arith.constant 0 : i32
    return %arg0, %c0_i32, %c0_i32_0 : i32, i32, i32
  }
  func.func @transform_6(%arg0: i32, %arg1: i32) -> (i32, i32, i32) {
    %c0_i32 = arith.constant 0 : i32
    %c0_i32_0 = arith.constant 0 : i32
    %c0_i32_1 = arith.constant 0 : i32
    return %arg0, %c0_i32, %c0_i32_0 : i32, i32, i32
  }
  func.func @transform_7(%arg0: i32, %arg1: i32) -> (i32, i32, i32) {
    %c0_i32 = arith.constant 0 : i32
    %c0_i32_0 = arith.constant 0 : i32
    %c0_i32_1 = arith.constant 0 : i32
    return %arg0, %c0_i32, %c0_i32_0 : i32, i32, i32
  }
}

</mosaic_0001>

<bundles_post_ra>
// kernel: tpu_custom_call.1
= control target key start
LH: loop header
LB: loop body
LE: loop exit
PB: predicated region body
PF: predicated region fallthrough
CT: control target
= control target key end

     0   :  { %vm55_vm0 = vcmask 523264   ;;  %s964_s0 = inlined_call_operand.vmem [shape: f32[16,64], index: 0, kind: input, shape index: {}]   ;;  %s965_s1 = inlined_call_operand.vmem [shape: f32[16,64], index: 1, kind: input, shape index: {}]   ;;  %s966_s2 = inlined_call_operand.vmem [shape: f32[128,64], index: 2, kind: input, shape index: {}]   ;;  %s967_s3 = inlined_call_operand.vmem [shape: s32[16,1], index: 3, kind: input, shape index: {}]   ;;  %s968_s4 = inlined_call_operand.vmem [shape: s32[1,16], index: 4, kind: input, shape index: {}]   ;;  %s969_s5 = inlined_call_operand.hbm [shape: f32[1,1,1], index: 5, kind: output, shape index: {0}]   ;;  %s970_s6 = inlined_call_operand.vmem [shape: f32[1,16,1], index: 6, kind: output, shape index: {1}]   ;;  %s971_s7 = inlined_call_operand.vmem [shape: f32[1,16,1], index: 7, kind: output, shape index: {2}]  }
   0x1   :  { %v719_v0 = vld [vmem:[%s966_s2 + $0x70] sm:$0xff]  ;;  %v724_v1 = vld [vmem:[%s966_s2 + $0x60] sm:$0xff]  ;;  %v729_v2 = vld [vmem:[%s966_s2 + $0x78] sm:$0xff] }
   0x2   :  { %v256_v3 = vmul.f32 %v719_v0, %v719_v0  ;;  %v254_v4 = vmul.f32 %v724_v1, %v724_v1  ;;  %v257_v5 = vmul.f32 %v729_v2, %v729_v2  ;;  %v740_v6 = vld [vmem:[%s966_s2 + $0x68] sm:$0xff]  ;;  %v747_v8 = vld [vmem:[%s966_s2 + $0x58] sm:$0xff]  ;;  %v752_v9 = vld [vmem:[%s966_s2 + $0x50] sm:$0xff] }
   0x3   :  { %v255_v7 = vmul.f32 %v740_v6, %v740_v6  ;;  %v253_v14 = vmul.f32 %v747_v8, %v747_v8  ;;  %v252_v15 = vmul.f32 %v752_v9, %v752_v9  ;;  %v765_v16 = vld [vmem:[%s966_s2 + $0x48] sm:$0xff]  ;;  %v770_v17 = vld [vmem:[%s966_s2 + $0x40] sm:$0xff] }
   0x4   :  { %v301_v10 = vsel %vm55_vm0, %v256_v3, 0.0  ;;  %v295_v11 = vsel %vm55_vm0, %v254_v4, 0.0  ;;  %v304_v12 = vsel %vm55_vm0, %v257_v5, 0.0 }
   0x5   :  { %302 = vadd.xlane.f32.xlu0 %v301_v10  ;;  %296 = vadd.xlane.f32.xlu1 %v295_v11  ;;  %v298_v13 = vsel %vm55_vm0, %v255_v7, 0.0 }
   0x6   :  { %13 = vsyncpa [#allocation8], 0  ;;  %v292_v18 = vsel %vm55_vm0, %v253_v14, 0.0  ;;  %v289_v19 = vsel %vm55_vm0, %v252_v15, 0.0  ;;  %v251_v20 = vmul.f32 %v765_v16, %v765_v16  ;;  %v250_v21 = vmul.f32 %v770_v17, %v770_v17  ;;  %v781_v22 = vld [vmem:[%s966_s2 + $0x38] sm:$0xff]  ;;  %v786_v23 = vld [vmem:[%s966_s2 + $0x30] sm:$0xff] }
   0x7   :  { %v249_v26 = vmul.f32 %v781_v22, %v781_v22  ;;  %v248_v27 = vmul.f32 %v786_v23, %v786_v23  ;;  %v797_v28 = vld [vmem:[%s966_s2 + $0x28] sm:$0xff]  ;;  %v802_v29 = vld [vmem:[%s966_s2 + $0x20] sm:$0xff]  ;;  %v813_v34 = vld [vmem:[%s966_s2 + $0x18] sm:$0xff]  ;;  %v672_v60 = vmov 0.0   ;;  %vm82_vm1 = vcmask 7168  }
   0x8   :  { %v286_v24 = vsel %vm55_vm0, %v251_v20, 0.0  ;;  %v283_v25 = vsel %vm55_vm0, %v250_v21, 0.0  ;;  %v247_v32 = vmul.f32 %v797_v28, %v797_v28  ;;  %v246_v33 = vmul.f32 %v802_v29, %v802_v29  ;;  %v818_v35 = vld [vmem:[%s966_s2 + $0x10] sm:$0xff]  ;;  %v829_v40 = vld [vmem:[%s964_s0 + $0x8] sm:$0xff]  ;;  %v834_v41 = vld [vmem:[%s964_s0] sm:$0xff]  ;;  %566 = vmatprep.subr.bf16.mxu1 %v672_v60  ;;  %560 = vmatprep.subr.bf16.mxu0 %v672_v60  ;;  %504 = vst.msk [vmem:[%s970_s6] sm:$0xff] %vm82_vm1, %v672_v60 }
   0x9   :  { %305 = vadd.xlane.f32.xlu0 %v304_v12  ;;  %299 = vadd.xlane.f32.xlu1 %v298_v13  ;;  %v280_v30 = vsel %vm55_vm0, %v249_v26, 0.0  ;;  %v277_v31 = vsel %vm55_vm0, %v248_v27, 0.0  ;;  %v245_v38 = vmul.f32 %v813_v34, %v813_v34  ;;  %v244_v39 = vmul.f32 %v818_v35, %v818_v35  ;;  %v845_v46 = vld [vmem:[%s965_s1 + $0x8] sm:$0xff]  ;;  %v850_v47 = vld [vmem:[%s965_s1] sm:$0xff]  ;;  %505 = vst.msk [vmem:[%s970_s6 + $0x8] sm:$0xff] %vm82_vm1, %v672_v60 }
   0xa   :  { %v274_v36 = vsel %vm55_vm0, %v247_v32, 0.0  ;;  %v271_v37 = vsel %vm55_vm0, %v246_v33, 0.0  ;;  %v54_v44 = vmul.f32 %v829_v40, %v829_v40  ;;  %v53_v45 = vmul.f32 %v834_v41, %v834_v41  ;;  %v861_v52 = vld [vmem:[%s966_s2 + $0x8] sm:$0xff]  ;;  %v866_v53 = vld [vmem:[%s966_s2] sm:$0xff]  ;;  %506 = vst.msk [vmem:[%s971_s7] sm:$0xff] %vm82_vm1, %v672_v60  ;;  %507 = vst.msk [vmem:[%s971_s7 + $0x8] sm:$0xff] %vm82_vm1, %v672_v60 }
   0xb   :  { %v268_v42 = vsel %vm55_vm0, %v245_v38, 0.0  ;;  %v265_v43 = vsel %vm55_vm0, %v244_v39, 0.0  ;;  %v97_v50 = vmul.f32 %v845_v46, %v845_v46  ;;  %v96_v51 = vmul.f32 %v850_v47, %v850_v47  ;;  %v169_v61 = vld [vmem:[%s967_s3 + $0x8] sm:$0xff]  ;;  %v168_v62 = vld [vmem:[%s967_s3] sm:$0xff] }
   0xc   :  { %v59_v48 = vsel %vm55_vm0, %v54_v44, 0.0  ;;  %v56_v49 = vsel %vm55_vm0, %v53_v45, 0.0  ;;  %v243_v56 = vmul.f32 %v861_v52, %v861_v52  ;;  %v242_v57 = vmul.f32 %v866_v53, %v866_v53 }
   0xd   :  { %293 = vadd.xlane.f32.xlu1 %v292_v18  ;;  %290 = vadd.xlane.f32.xlu0 %v289_v19  ;;  %v102_v54 = vsel %vm55_vm0, %v97_v50, 0.0  ;;  %v99_v55 = vsel %vm55_vm0, %v96_v51, 0.0  ;;  %vm673_vm2 = vmmov 0   ;;  %v674_v63 = vmov 0  }
   0xe   :  { %v262_v58 = vsel %vm55_vm0, %v243_v56, 0.0  ;;  %v259_v59 = vsel %vm55_vm0, %v242_v57, 0.0  ;;  %562 = vmatprep.mubr.msk.bf16.mxu0 %vm673_vm2, %v672_v60  ;;  %582 = vmatprep.mubr.msk.bf16.mxu1 %vm673_vm2, %v672_v60  ;;  %vm76_vm3 = vcmask 519168   ;;  %vm79_vm4 = vcmask 0  }
   0xf   :  { %591 = vset.pattern.permute.xlu1 %v674_v63  ;;  %590 = vset.pattern.permute.xlu0 %v674_v63  ;;  %80 = vst.msk [vmem:[#allocation3] sm:$0x1] %vm79_vm4, %v672_v60  ;;  %81 = vst.msk [vmem:[#allocation4] sm:$0x1] %vm79_vm4, %v672_v60  ;;  %vm185_vm6 = vcmask 130048  }
  0x11   :  { %287 = vadd.xlane.f32.xlu1 %v286_v24  ;;  %284 = vadd.xlane.f32.xlu0 %v283_v25 }
  0x15   :  { %281 = vadd.xlane.f32.xlu1 %v280_v30  ;;  %278 = vadd.xlane.f32.xlu0 %v277_v31 }
  0x19   :  { %275 = vadd.xlane.f32.xlu1 %v274_v36  ;;  %272 = vadd.xlane.f32.xlu0 %v271_v37 }
  0x1d   :  { %269 = vadd.xlane.f32.xlu1 %v268_v42  ;;  %266 = vadd.xlane.f32.xlu0 %v265_v43 }
  0x21   :  { %60 = vadd.xlane.f32.xlu1 %v59_v48  ;;  %57 = vadd.xlane.f32.xlu0 %v56_v49 }
  0x25   :  { %103 = vadd.xlane.f32.xlu1 %v102_v54  ;;  %100 = vadd.xlane.f32.xlu0 %v99_v55 }
  0x29   :  { %263 = vadd.xlane.f32.xlu1 %v262_v58  ;;  %260 = vadd.xlane.f32.xlu0 %v259_v59 }
  0x3a   :  { %175 = vperm.xlu1 %591, %v169_v61  }
  0x3e   :  { %449 = vperm.xlu1 %591, %v168_v62  }
  0x3f   :  { %172 = vperm.xlu0 %590, %v168_v62  }
  0x42   :  { %452 = vperm.xlu1 %591, %v169_v61  }
  0x8e   :  { %v303_v3 = vpop.xlane.xlu0 %302  ;;  %v297_v4 = vpop.xlane.xlu1 %296 }
  0x8f   :  { %v321_v5 = vmax.f32 %v303_v3, 1e-24  ;;  %v319_v7 = vmax.f32 %v297_v4, 1e-24 }
  0x91   :  { %594 = vrsqrt.f32 %v321_v5 }
  0x92   :  { %v306_v10 = vpop.xlane.xlu0 %305  ;;  %v300_v11 = vpop.xlane.xlu1 %299 }
  0x93   :  { %v322_v12 = vmax.f32 %v306_v10, 1e-24  ;;  %v320_v13 = vmax.f32 %v300_v11, 1e-24 }
  0x95   :  { %596 = vrsqrt.f32 %v322_v12 }
  0x96   :  { %598 = vrsqrt.f32 %v319_v7  ;;  %v294_v14 = vpop.xlane.xlu1 %293  ;;  %v291_v15 = vpop.xlane.xlu0 %290 }
  0x97   :  { %600 = vrsqrt.f32 %v320_v13  ;;  %v318_v18 = vmax.f32 %v294_v14, 1e-24  ;;  %v317_v19 = vmax.f32 %v291_v15, 1e-24 }
  0x99   :  { %602 = vrsqrt.f32 %v318_v18 }
  0x9a   :  { %v288_v20 = vpop.xlane.xlu1 %287  ;;  %v285_v21 = vpop.xlane.xlu0 %284  ;;  %604 = vrsqrt.f32 %v317_v19 }
  0x9b   :  { %v316_v27 = vmax.f32 %v288_v20, 1e-24  ;;  %v315_v30 = vmax.f32 %v285_v21, 1e-24 }
  0x9d   :  { %606 = vrsqrt.f32 %v316_v27 }
  0x9e   :  { %v282_v24 = vpop.xlane.xlu1 %281  ;;  %v279_v25 = vpop.xlane.xlu0 %278  ;;  %608 = vrsqrt.f32 %v315_v30 }
  0x9f   :  { %v595_v26 = vpop.eup %594  ;;  %v314_v45 = vmax.f32 %v282_v24, 1e-24  ;;  %v313_v51 = vmax.f32 %v279_v25, 1e-24 }
  0xa0   :  { %v353_v37 = vmul.f32 %v595_v26, %v719_v0 }
  0xa1   :  { %610 = vrsqrt.f32 %v314_v45 }
  0xa2   :  { %v597_v31 = vpop.eup %596  ;;  %v276_v32 = vpop.xlane.xlu1 %275  ;;  %612 = vrsqrt.f32 %v313_v51 }
  0xa3   :  { %v273_v33 = vpop.xlane.xlu0 %272  ;;  %v599_v36 = vpop.eup %598  ;;  %v354_v38 = vmul.f32 %v597_v31, %v729_v2  ;;  %v312_v4 = vmax.f32 %v276_v32, 1e-24 }
  0xa4   :  { %v601_v39 = vpop.eup %600  ;;  %v351_v49 = vmul.f32 %v599_v36, %v724_v1  ;;  %v311_v7 = vmax.f32 %v273_v33, 1e-24 }
  0xa5   :  { %v362_v42 = vpack.c.bf16 %v354_v38, %v353_v37  ;;  %v352_v50 = vmul.f32 %v601_v39, %v740_v6 }
  0xa6   :  { %v270_v43 = vpop.xlane.xlu1 %269  ;;  %v603_v54 = vpop.eup %602 }
  0xa7   :  { %v267_v44 = vpop.xlane.xlu0 %266  ;;  %v393_v48 = vsel %vm55_vm0, %v362_v42, 0  ;;  %v605_v0 = vpop.eup %604  ;;  %v361_v58 = vpack.c.bf16 %v352_v50, %v351_v49  ;;  %v350_v1 = vmul.f32 %v603_v54, %v747_v8  ;;  %v310_v19 = vmax.f32 %v270_v43, 1e-24 }
  0xa8   :  { %567 = vmatpush3.bf16.xpose.msra.mxu1 %v393_v48  ;;  %v349_v59 = vmul.f32 %v605_v0, %v752_v9  ;;  %v309_v21 = vmax.f32 %v267_v44, 1e-24 }
  0xa9   :  { %568 = vmatprep.subr.bf16.mxu1 %v672_v60  ;;  %v390_v3 = vsel %vm55_vm0, %v361_v58, 0 }
  0xaa   :  { %v61_v2 = vpop.xlane.xlu1 %60  ;;  %v607_v5 = vpop.eup %606  ;;  %v360_v10 = vpack.c.bf16 %v350_v1, %v349_v59 }
  0xab   :  { %v58_v55 = vpop.xlane.xlu0 %57  ;;  %v63_v56 = vmax.f32 %v61_v2, 1e-24  ;;  %v609_v11 = vpop.eup %608  ;;  %v348_v12 = vmul.f32 %v607_v5, %v765_v16 }
  0xac   :  { %v62_v57 = vmax.f32 %v58_v55, 1e-24  ;;  %v387_v8 = vsel %vm55_vm0, %v360_v10, 0  ;;  %v347_v9 = vmul.f32 %v609_v11, %v770_v17 }
  0xad   :  { %614 = vrsqrt.f32 %v63_v56 }
  0xae   :  { %616 = vrsqrt.f32 %v62_v57  ;;  %v104_v6 = vpop.xlane.xlu1 %103  ;;  %v611_v13 = vpop.eup %610  ;;  %v359_v15 = vpack.c.bf16 %v348_v12, %v347_v9 }
  0xaf   :  { %v101_v61 = vpop.xlane.xlu0 %100  ;;  %v106_v62 = vmax.f32 %v104_v6, 1e-24  ;;  %v613_v14 = vpop.eup %612  ;;  %v346_v27 = vmul.f32 %v611_v13, %v781_v22 }
  0xb0   :  { %v105_v63 = vmax.f32 %v101_v61, 1e-24  ;;  %569 = vmatpush3.bf16.xpose.msra.mxu1 %v390_v3  ;;  %v384_v17 = vsel %vm55_vm0, %v359_v15, 0  ;;  %v345_v16 = vmul.f32 %v613_v14, %v786_v23 }
  0xb1   :  { %618 = vrsqrt.f32 %v106_v62  ;;  %570 = vmatprep.subr.bf16.mxu1 %v672_v60 }
  0xb2   :  { %620 = vrsqrt.f32 %v105_v63  ;;  %v264_v30 = vpop.xlane.xlu1 %263  ;;  %v358_v23 = vpack.c.bf16 %v346_v27, %v345_v16 }
  0xb3   :  { %622 = vrsqrt.f32 %v312_v4  ;;  %v261_v33 = vpop.xlane.xlu0 %260  ;;  %v308_v37 = vmax.f32 %v264_v30, 1e-24 }
  0xb4   :  { %624 = vrsqrt.f32 %v311_v7  ;;  %v307_v22 = vmax.f32 %v261_v33, 1e-24  ;;  %v381_v44 = vsel %vm55_vm0, %v358_v23, 0 }
  0xb5   :  { %626 = vrsqrt.f32 %v310_v19  ;;  %v440_v19 = vlaneseq }
  0xb6   :  { %628 = vrsqrt.f32 %v309_v21  ;;  %v176_v62 = vpop.permute.xlu1 %175 }
  0xb7   :  { %630 = vrsqrt.f32 %v308_v37 }
  0xb8   :  { %571 = vmatpush3.bf16.xpose.msra.mxu1 %v387_v8  ;;  %632 = vrsqrt.f32 %v307_v22 }
  0xb9   :  { %572 = vmatprep.subr.bf16.mxu1 %v672_v60 }
  0xba   :  { %v615_v18 = vpop.eup %614 }
  0xbb   :  { %v617_v20 = vpop.eup %616  ;;  %v67_v24 = vmul.f32 %v615_v18, %v829_v40 }
  0xbc   :  { %v66_v25 = vmul.f32 %v617_v20, %v834_v41  ;;  %v450_v20 = vpop.permute.xlu1 %449 }
  0xbd   :  { %v548_v26 = vpack.c.bf16 %v67_v24, %v67_v24 }
  0xbe   :  { %v619_v31 = vpop.eup %618  ;;  %v547_v32 = vpack.c.bf16 %v66_v25, %v66_v25 }
  0xbf   :  { %v621_v36 = vpop.eup %620  ;;  %78 = vst.msk [vmem:[#allocation2 + $0x4] sm:$0xf] %vm76_vm3, %v548_v26  ;;  %v110_v40 = vmul.f32 %v619_v31, %v845_v46  ;;  %v441_v26 = vand.u32 127, %v440_v19 }
  0xc0   :  { %77 = vst.msk [vmem:[#allocation2] sm:$0xf] %vm76_vm3, %v547_v32  ;;  %573 = vmatpush3.bf16.xpose.msra.mxu1 %v384_v17  ;;  %v109_v41 = vmul.f32 %v621_v36, %v850_v47  ;;  %v623_v38 = vpop.eup %622  ;;  %v453_v31 = vpop.permute.xlu1 %452 }
  0xc1   :  { %574 = vmatprep.subr.bf16.mxu1 %v672_v60  ;;  %v625_v39 = vpop.eup %624  ;;  %v344_v45 = vmul.f32 %v623_v38, %v797_v28  ;;  %vm456_vm8 = vcmp.lt.s32.totalorder %v441_v26, 24  ;;  %vm454_vm9 = vcmp.ne.s32.totalorder %v441_v26, %v450_v20  ;;  %vm455_vm10 = vcmp.ne.s32.totalorder %v441_v26, %v453_v31  ;;  %v486_v26 = vld [vmem:[#allocation4] sm:$0x1] }
  0xc2   :  { %v111_v42 = vpack.c.bf16 %v110_v40, %v109_v41  ;;  %v343_v46 = vmul.f32 %v625_v39, %v802_v29  ;;  %v627_v49 = vpop.eup %626  ;;  %vm457_vm11 = vmand %vm454_vm9, %vm456_vm8 }
  0xc3   :  { %v629_v50 = vpop.eup %628  ;;  %v342_v0 = vmul.f32 %v627_v49, %v813_v34  ;;  %vm458_vm12 = vmand %vm455_vm10, %vm456_vm8 }
  0xc4   :  { %v121_v43 = vsel %vm55_vm0, %v111_v42, 0  ;;  %v357_v48 = vpack.c.bf16 %v344_v45, %v343_v46  ;;  %v341_v54 = vmul.f32 %v629_v50, %v818_v35  ;;  %v631_v2 = vpop.eup %630 }
  0xc5   :  { %561 = vmatpush3.bf16.xpose.msra.mxu0 %v121_v43  ;;  %v633_v28 = vpop.eup %632  ;;  %v340_v56 = vmul.f32 %v631_v2, %v861_v52  ;;  %v542_v52 = vld [vmem:[%s968_s4] ss:$0 sm:$0xff]  ;;  %s675_s4 = smov [#allocation7]  }
  0xc6   :  { %v378_v51 = vsel %vm55_vm0, %v357_v48, 0  ;;  %v356_v29 = vpack.c.bf16 %v342_v0, %v341_v54  ;;  %v339_v55 = vmul.f32 %v633_v28, %v866_v53  ;;  %v173_v53 = vpop.permute.xlu0 %172  ;;  %vm182_vm7 = vcmp.eq.s32.totalorder %v176_v62, %v542_v52  ;;  %s514_s26 = sshll.u32 %s675_s4, 4  ;;  %s515_s26 = int_to_ptr.vmem [resolvable:$true] %s514_s26 }
  0xc7   :  { %v592_v47 = vld [vmem:[#allocation2] sm:$0xff]   ;;  %vm181_vm5 = vcmp.eq.s32.totalorder %v173_v53, %v542_v52  ;;  %s650_s27 = scalar_lea.vmem %s515_s26, 16  ;;  %s654_s28 = scalar_lea.vmem %s515_s26, 32 }
  0xc8   :  { %575 = vmatpush3.bf16.xpose.msra.mxu1 %v381_v44  ;;  %v375_v57 = vsel %vm55_vm0, %v356_v29, 0  ;;  %v355_v58 = vpack.c.bf16 %v340_v56, %v339_v55  ;;  %v593_v34 = vld [vmem:[#allocation2] sm:$0xff]   ;;  %p651_p0 = scmp.ne.s32.totalorder %s515_s26, %s650_s27  ;;  %p655_p1 = scmp.lt.s32.totalorder %s515_s26, %s515_s26 }
  0xc9   :  { %576 = vmatprep.subr.bf16.mxu1 %v672_v60  ;;  %p656_p2 = scmp.lt.s32.totalorder %s654_s28, %s650_s27 }
  0xca   :  { %v372_v35 = vsel %vm55_vm0, %v355_v58, 0 }
  0xcb   :  { %p657_p3 = por %p656_p2, %p655_p1 }
  0xcc   :  { %563 = vmatmul.mubr.msk.bf16.vlgmr.msra.gmra.mxu0 %vm55_vm0, %v592_v47 }
  0xcd   :  { %p658_p4 = pnand %p657_p3, %p651_p0 }
  0xd0   :  { %577 = vmatpush3.bf16.xpose.msra.mxu1 %v378_v51 }
  0xd1   :  { %578 = vmatprep.subr.bf16.mxu1 %v672_v60 }
  0xd8   :  { %579 = vmatpush3.bf16.xpose.msra.mxu1 %v375_v57 }
  0xd9   :  { %580 = vmatprep.subr.bf16.mxu1 %v672_v60 }
  0xe0   :  { %581 = vmatpush3.bf16.xpose.msra.mxu1 %v372_v35 }
  0xe7   :  { %583 = vmatmul.mubr.msk.bf16.vlgmr.msra.gmra.mxu1 %vm55_vm0, %v593_v34 }
 0x18c   :  { %v157_v59 = vpop.f32.mrf.mxu0 }
 0x18d   :  { %v540_v1 = vadd.f32 -0.1, %v157_v59 }
 0x18e   :  { %v564_v6 = vpop.f32.mrf.mxu0 }
 0x18f   :  { %v166_v61 = vmul.f32 -32.0, %v540_v1 }
 0x190   :  { %v160_v63 = vpop.f32.mrf.mxu0 }
 0x191   :  { %v541_v3 = vadd.f32 -0.1, %v160_v63  ;;  %v183_v4 = vsel %vm181_vm5, %v166_v61, -1e+30 }
 0x192   :  { %v565_v5 = vpop.f32.mrf.mxu0  ;;  %v186_v60 = vsel %vm185_vm6, %v183_v4, -inf }
 0x193   :  { %v167_v7 = vmul.f32 -32.0, %v541_v3 }
 0x195   :  { %v184_v10 = vsel %vm182_vm7, %v167_v7, -1e+30 }
 0x196   :  { %v187_v11 = vsel %vm185_vm6, %v184_v10, -inf }
 0x197   :  { %v188_v8 = vmax.f32 %v186_v60, %v187_v11 }
 0x199   :  { %v189_v9 = vrot.slane %v188_v8, 4 }
 0x19b   :  { %v190_v12 = vmax.f32 %v188_v8, %v189_v9 }
 0x19d   :  { %v191_v13 = vrot.slane %v190_v12, 2 }
 0x19f   :  { %v192_v14 = vmax.f32 %v190_v12, %v191_v13 }
 0x1a1   :  { %v193_v15 = vrot.slane %v192_v14, 1 }
 0x1a3   :  { %v194_v18 = vmax.f32 %v192_v14, %v193_v15 }
 0x1a5   :  { %v949_v21 = vmax.f32 %v194_v18, 0.0 }
 0x1a7   :  { %v196_v24 = vsub.f32 %v183_v4, %v949_v21  ;;  %v197_v25 = vsub.f32 %v184_v10, %v949_v21  ;;  %v429_v17 = vpop.f32.mrf.mxu1  ;;  %v211_v39 = vsub.f32 0.0, %v949_v21 }
 0x1a8   :  { %v545_v16 = vadd.f32 0.1, %v429_v17 }
 0x1a9   :  { %v198_v27 = vmul.f32 1.442695, %v196_v24  ;;  %v200_v30 = vmul.f32 1.442695, %v197_v25  ;;  %v584_v32 = vpop.f32.mrf.mxu1  ;;  %v212_v44 = vmul.f32 1.442695, %v211_v39 }
 0x1aa   :  { %v438_v36 = vmul.f32 32.0, %v545_v16 }
 0x1ab   :  { %634 = vpow2.f32 %v198_v27  ;;  %v432_v33 = vpop.f32.mrf.mxu1 }
 0x1ac   :  { %636 = vpow2.f32 %v200_v30  ;;  %v546_v40 = vadd.f32 0.1, %v432_v33  ;;  %v459_v38 = vsel %vm457_vm11, %v438_v36, -1e+30 }
 0x1ad   :  { %v585_v41 = vpop.f32.mrf.mxu1  ;;  %638 = vpow2.f32 %v212_v44 }
 0x1ae   :  { %v439_v37 = vmul.f32 32.0, %v546_v40 }
 0x1b0   :  { %v460_v23 = vsel %vm458_vm12, %v439_v37, -1e+30 }
 0x1b1   :  { %v461_v22 = vmax.f32 %v459_v38, %v460_v23 }
 0x1b3   :  { %v462_v42 = vrot.slane %v461_v22, 4 }
 0x1b5   :  { %v463_v43 = vmax.f32 %v461_v22, %v462_v42 }
 0x1b7   :  { %v464_v46 = vrot.slane %v463_v43, 2 }
 0x1b8   :  { %v635_v45 = vpop.eup %634 }
 0x1b9   :  { %v637_v47 = vpop.eup %636  ;;  %v465_v48 = vmax.f32 %v463_v43, %v464_v46  ;;  %v202_v49 = vsel %vm185_vm6, %v635_v45, 0.0 }
 0x1ba   :  { %v203_v50 = vsel %vm185_vm6, %v637_v47, 0.0  ;;  %v639_v59 = vpop.eup %638 }
 0x1bb   :  { %v466_v51 = vrot.slane %v465_v48, 1  ;;  %v204_v54 = vadd.f32 %v203_v50, %v202_v49 }
 0x1bd   :  { %v467_v0 = vmax.f32 %v465_v48, %v466_v51  ;;  %v205_v2 = vrot.slane %v204_v54, 4 }
 0x1bf   :  { %v468_v28 = vmax.f32 %v467_v0, 0.0  ;;  %v206_v29 = vadd.f32 %v205_v2, %v204_v54 }
 0x1c1   :  { %v469_v55 = vsub.f32 %v459_v38, %v468_v28  ;;  %v470_v56 = vsub.f32 %v460_v23, %v468_v28  ;;  %v207_v57 = vrot.slane %v206_v29, 2  ;;  %v482_v6 = vsub.f32 0.0, %v468_v28 }
 0x1c3   :  { %v471_v58 = vmul.f32 1.442695, %v469_v55  ;;  %v473_v35 = vmul.f32 1.442695, %v470_v56  ;;  %v208_v34 = vadd.f32 %v207_v57, %v206_v29  ;;  %v483_v61 = vmul.f32 1.442695, %v482_v6 }
 0x1c5   :  { %640 = vpow2.f32 %v471_v58  ;;  %v209_v52 = vrot.slane %v208_v34, 1 }
 0x1c6   :  { %642 = vpow2.f32 %v473_v35 }
 0x1c7   :  { %v210_v53 = vadd.f32 %v209_v52, %v208_v34 }
 0x1c9   :  { %v214_v1 = vadd.f32 %v639_v59, %v210_v53 }
 0x1cb   :  { %644 = vlog2.f32 %v214_v1 }
 0x1cc   :  { %646 = vpow2.f32 %v483_v61 }
 0x1d2   :  { %v641_v62 = vpop.eup %640 }
 0x1d3   :  { %v643_v63 = vpop.eup %642 }
 0x1d4   :  { %v475_v3 = vadd.f32 %v643_v63, %v641_v62 }
 0x1d6   :  { %v476_v4 = vrot.slane %v475_v3, 4 }
 0x1d8   :  { %v645_v5 = vpop.eup %644  ;;  %v477_v7 = vadd.f32 %v476_v4, %v475_v3 }
 0x1d9   :  { %v216_v60 = vmul.f32 0.6931472, %v645_v5  ;;  %v647_v14 = vpop.eup %646 }
 0x1da   :  { %v478_v10 = vrot.slane %v477_v7, 2 }
 0x1db   :  { %v217_v11 = vadd.f32 %v216_v60, %v949_v21 }
 0x1dc   :  { %v479_v8 = vadd.f32 %v478_v10, %v477_v7 }
 0x1dd   :  { %v218_v9 = vsel %vm185_vm6, %v217_v11, 0.0 }
 0x1de   :  { %219 = vadd.xlane.f32.xlu0 %v218_v9  ;;  %v480_v12 = vrot.slane %v479_v8, 1 }
 0x1e0   :  { %v481_v13 = vadd.f32 %v480_v12, %v479_v8 }
 0x1e2   :  { %v485_v15 = vadd.f32 %v647_v14, %v481_v13 }
 0x1e4   :  { %648 = vlog2.f32 %v485_v15 }
 0x1f1   :  { %v649_v18 = vpop.eup %648 }
 0x1f2   :  { %v488_v19 = vmul.f32 0.6931472, %v649_v18 }
 0x1f4   :  { %v489_v20 = vadd.f32 %v488_v19, %v468_v28 }
 0x1f6   :  { %490 = vadd.xlane.f32.xlu1 %v489_v20 }
 0x267   :  { %v220_v24 = vpop.xlane.xlu0 %219 }
 0x268   :  { %v221_v25 = vmul.f32 0.0625, %v220_v24 }
 0x26a   :  { %223 = vst.msk [vmem:[#allocation3] sm:$0x1] %vm79_vm4, %v221_v25 }
 0x271   :  { %v498_v30 = vld [vmem:[#allocation3] sm:$0x1] }
 0x27f   :  { %v491_v17 = vpop.xlane.xlu1 %490 }
 0x280   :  { %v492_v21 = vadd.f32 %v491_v17, %v486_v26 }
 0x282   :  { %494 = vst.msk [vmem:[#allocation4] sm:$0x1] %vm79_vm4, %v492_v21 }
 0x289   :  { %v499_v16 = vld [vmem:[#allocation4] sm:$0x1] }
 0x28a   :  { %v500_v27 = vmul.f32 0.041666668, %v499_v16 }
 0x28c   :  { %v501_v31 = vadd.f32 %v500_v27, %v498_v30 }
 0x28e   :  { %502 = vst.msk [vmem:[#allocation7] sm:$0x1] %vm79_vm4, %v501_v31 }
 0x28f   :  { %661 = shalt.err (!%p658_p4)
}
 0x290   :  { %517 = dma.vmem_to_hbm [thread:$0]  %s515_s26, 16, %s969_s5, [#allocation8]  }
 0x291   :  { %670 = dma.done.wait [#allocation8], 16  }
 0x292   :  { %671 = vsyncadd [#allocation8], 4294967280 }
 0x293   :  { %529 = vsyncpa [#allocation8], 1 }

</bundles_post_ra>
